<compile_context>
chip_gen: v6e
topology: v6e:2x2x1
jax: 0.10.0
libtpu: 0.0.40
codegen_flags: <defaults>
</compile_context>

<pallas_src>
import jax
import jax.numpy as jnp
from jax.experimental import pallas as pl
from jax.experimental.pallas import tpu as pltpu


def cls_conv1x1_kernel(cls_ref, wt_ref, b_ref, out_ref):
    # cls_ref: (TB, E) bf16 CLS activations
    # wt_ref:  (E, Fp) bf16 transposed 1x1-conv weight (F padded to 128)
    # b_ref:   (1, Fp) f32 conv bias
    # out_ref: (TB, Fp) f32
    y = jnp.dot(cls_ref[...], wt_ref[...],
                preferred_element_type=jnp.float32)   # MXU, f32 accumulate
    out_ref[...] = (y + b_ref[...]).astype(out_ref.dtype)


def _round_up(x, m):
    return ((x + m - 1) // m) * m


def bilstm_bert_only_forward(embed, conv_w, conv_b, *, max_batch_tile=256):
    """embed: (B, S, E) f32 BERT last hidden states; conv_w: (F, E, 1, 1); conv_b: (F,).

    Returns the squeezed (B, F) conv output (matches torch `.squeeze()`,
    i.e. the batch dim is also dropped when B == 1).
    """
    B, S, E = embed.shape
    F_out = conv_w.shape[0]

    # --- wrapper-side CLS slice: only (B, E) ever reaches the kernel ---
    cls = embed[:, 0, :]                               # (B, E)

    # --- pad F to a lane-dense multiple of 128 ---
    F_pad = _round_up(F_out, 128)
    wt = conv_w.reshape(F_out, E).T                    # (E, F)
    if F_pad != F_out:
        wt = jnp.pad(wt, ((0, 0), (0, F_pad - F_out)))
        bias = jnp.pad(conv_b, (0, F_pad - F_out))
    else:
        bias = conv_b
    b2 = bias.reshape(1, F_pad).astype(jnp.float32)

    # --- bf16 matmul operands (f32 accumulation inside the kernel) ---
    wt_bf = wt.astype(jnp.bfloat16)

    # --- batch tiling: one big tile (pad B), no divisibility assert ---
    if B >= max_batch_tile:
        tb = max_batch_tile
    else:
        tb = _round_up(B, 16)                          # bf16 sublane-friendly
    B_pad = _round_up(B, tb)
    cls_bf = cls.astype(jnp.bfloat16)
    if B_pad != B:
        cls_bf = jnp.pad(cls_bf, ((0, B_pad - B), (0, 0)))

    grid = (B_pad // tb,)
    cost = pl.CostEstimate(
        flops=2 * B_pad * E * F_pad,
        transcendentals=0,
        bytes_accessed=(B_pad * E * 2 + E * F_pad * 2
                        + F_pad * 4 + B_pad * F_pad * 4),
    )

    out = pl.pallas_call(
        cls_conv1x1_kernel,
        out_shape=jax.ShapeDtypeStruct((B_pad, F_pad), jnp.float32),
        grid_spec=pltpu.PrefetchScalarGridSpec(
            num_scalar_prefetch=0,
            grid=grid,
            in_specs=[
                pl.BlockSpec((tb, E), lambda i: (i, 0)),
                pl.BlockSpec((E, F_pad), lambda i: (0, 0)),
                pl.BlockSpec((1, F_pad), lambda i: (0, 0)),
            ],
            out_specs=pl.BlockSpec((tb, F_pad), lambda i: (i, 0)),
        ),
        compiler_params=pltpu.CompilerParams(
            dimension_semantics=("parallel",)),
        cost_estimate=cost,
    )(cls_bf, wt_bf, b2)

    out = out[:B, :F_out]
    # matches torch .squeeze() on the (B, F, 1, 1) conv output
    return jnp.squeeze(out)


def init_params(key, feature_size, text_embedding=768):
    # Conv2d(768, feature_size, kernel_size=1): weight (F, 768, 1, 1), bias (F,)
    # xavier_uniform_(gain=1): bound = sqrt(6 / (fan_in + fan_out))
    fan_in, fan_out = text_embedding, feature_size
    bound = (6.0 / (fan_in + fan_out)) ** 0.5
    w = jax.random.uniform(key, (feature_size, text_embedding, 1, 1),
                           minval=-bound, maxval=bound, dtype=jnp.float32)
    b = jnp.zeros((feature_size,), dtype=jnp.float32)
    return w, b


def reference_forward(embed, conv_w, conv_b):
    # plain-JAX f32 reference for verification
    cls = embed[:, 0, :]                                      # (B, E)
    y = cls @ conv_w.reshape(conv_w.shape[0], -1).T + conv_b  # (B, F)
    return jnp.squeeze(y)


if __name__ == "__main__":
    B, S, E = 8, 8, 768           # BERT hidden size is fixed at 768
    feature_size = 256

    key = jax.random.PRNGKey(0)
    k_embed, k_w = jax.random.split(key)

    # stand-in for BERT last hidden states outputs[2][-1]
    embed = jax.random.normal(k_embed, (B, S, E), dtype=jnp.float32)
    conv_w, conv_b = init_params(k_w, feature_size, E)

    out = bilstm_bert_only_forward(embed, conv_w, conv_b)
    out = jax.block_until_ready(out)

    ref = reference_forward(embed, conv_w, conv_b)
    assert out.shape == (B, feature_size), out.shape
    # bf16 matmul operands (f32 accumulate) -> compare with bf16-appropriate tolerance
    assert jnp.allclose(out, ref, atol=2e-2, rtol=2e-2)

    print("KERNEL_OK")
</pallas_src>

<mosaic_0001>
module attributes {stable_mosaic.version = 11 : i64} {
  func.func @cls_conv1x1_kernel(%arg0: i32, %arg1: memref<16x768xbf16, #tpu.memory_space<vmem>>, %arg2: memref<768x256xbf16, #tpu.memory_space<vmem>>, %arg3: memref<1x256xf32, #tpu.memory_space<vmem>>, %arg4: memref<16x256xf32, #tpu.memory_space<vmem>>) attributes {dimension_semantics = [#tpu.dimension_semantics<parallel>], iteration_bounds = array<i64: 1>, scalar_prefetch = 0 : i64, scratch_operands = 0 : i64, tpu.core_type = #tpu.core_type<tc>, window_params = [{transform_indices = @transform_0, window_bounds = array<i64: 16, 768>}, {pipeline_mode = #tpu.pipeline_mode<synchronous>, transform_indices = @transform_1, window_bounds = array<i64: 768, 256>}, {pipeline_mode = #tpu.pipeline_mode<synchronous>, transform_indices = @transform_2, window_bounds = array<i64: 1, 256>}, {transform_indices = @transform_3, window_bounds = array<i64: 16, 256>}]} {
    %c0 = arith.constant 0 : index
    %c0_0 = arith.constant 0 : index
    %0 = vector.load %arg1[%c0, %c0_0] : memref<16x768xbf16, #tpu.memory_space<vmem>>, vector<16x768xbf16>
    %c0_1 = arith.constant 0 : index
    %c0_2 = arith.constant 0 : index
    %1 = vector.load %arg2[%c0_1, %c0_2] : memref<768x256xbf16, #tpu.memory_space<vmem>>, vector<768x256xbf16>
    %cst = arith.constant dense<0.000000e+00> : vector<16x256xf32>
    %2 = tpu.matmul %0, %1, %cst {dimension_numbers = #tpu.dot_dimension_numbers<[1], [0], [0], [1], [0, 0, 1, 1], [], []>} : vector<16x768xbf16>, vector<768x256xbf16>, vector<16x256xf32> -> vector<16x256xf32>
    %c0_3 = arith.constant 0 : index
    %c0_4 = arith.constant 0 : index
    %3 = vector.load %arg3[%c0_3, %c0_4] : memref<1x256xf32, #tpu.memory_space<vmem>>, vector<1x256xf32>
    %4 = vector.broadcast %3 : vector<1x256xf32> to vector<16x256xf32>
    %5 = arith.addf %2, %4 : vector<16x256xf32>
    %c0_5 = arith.constant 0 : index
    %c0_6 = arith.constant 0 : index
    %6 = vector.load %arg4[%c0_5, %c0_6] : memref<16x256xf32, #tpu.memory_space<vmem>>, vector<16x256xf32>
    tpu.vector_store %arg4[%c0_5, %c0_6], %5 {strides = array<i32>} : memref<16x256xf32, #tpu.memory_space<vmem>>, vector<16x256xf32>,
    return
  }
  func.func @transform_0(%arg0: i32) -> (i32, i32) {
    %c0_i32 = arith.constant 0 : i32
    %c0_i32_0 = arith.constant 0 : i32
    return %arg0, %c0_i32 : i32, i32
  }
  func.func @transform_1(%arg0: i32) -> (i32, i32) {
    %c0_i32 = arith.constant 0 : i32
    %c0_i32_0 = arith.constant 0 : i32
    %c0_i32_1 = arith.constant 0 : i32
    return %c0_i32, %c0_i32_0 : i32, i32
  }
  func.func @transform_2(%arg0: i32) -> (i32, i32) {
    %c0_i32 = arith.constant 0 : i32
    %c0_i32_0 = arith.constant 0 : i32
    %c0_i32_1 = arith.constant 0 : i32
    return %c0_i32, %c0_i32_0 : i32, i32
  }
  func.func @transform_3(%arg0: i32) -> (i32, i32) {
    %c0_i32 = arith.constant 0 : i32
    %c0_i32_0 = arith.constant 0 : i32
    return %arg0, %c0_i32 : i32, i32
  }
}

</mosaic_0001>

<bundles_post_ra>
// kernel: tpu_custom_call.1
= control target key start
LH: loop header
LB: loop body
LE: loop exit
PB: predicated region body
PF: predicated region fallthrough
CT: control target
= control target key end

     0   :  { %8 = vsyncpa [#allocation3], 0  ;;  %s1189_s0 = inlined_call_operand.hbm [shape: bf16[16,768], index: 0, kind: input, shape index: {}]   ;;  %s1190_s1 = inlined_call_operand.hbm [shape: bf16[768,256], index: 1, kind: input, shape index: {}]   ;;  %s1191_s2 = inlined_call_operand.vmem [shape: f32[1,256], index: 2, kind: input, shape index: {}]   ;;  %s1192_s3 = inlined_call_operand.hbm [shape: f32[16,256], index: 3, kind: output, shape index: {}]  }
   0x1   :  { %9 = vsyncpa [#allocation6], 0 }
   0x2   :  { %10 = vsyncpa [#allocation4], 0  ;;  %s1148_s12 = smov [#allocation2]  }
   0x3   :  { %s16_s13 = sshll.u32 %s1148_s12, 4  ;;  %s17_s13 = int_to_ptr.vmem [resolvable:$true] %s16_s13 }
   0x4   :  { %s1090_s14 = scalar_lea.vmem %s17_s13, 768  ;;  %p1095_p1 = scmp.lt.s32.totalorder %s17_s13, %s17_s13 }
   0x5   :  { %p1091_p0 = scmp.ne.s32.totalorder %s17_s13, %s1090_s14  ;;  %p1096_p2 = scmp.lt.s32.totalorder %s1090_s14, %s1090_s14 }
   0x7   :  { %p1097_p3 = por %p1096_p2, %p1095_p1 }
   0x9   :  { %p1098_p4 = pnand %p1097_p3, %p1091_p0 }
   0xb   :  { %1101 = shalt.err (!%p1098_p4)
}
   0xc   :  { %s1149_s15 = smov 384   ;;  %s1150_s16 = smov 24  }
   0xd   :  { %22 = dma.hbm_to_vmem [thread:$0]  %s1189_s0, 768, %s17_s13, [#allocation3], %s1149_s15, %s1149_s15, %s1150_s16  }
   0xe   :  { %s1151_s19 = smov [#allocation5]  }
   0xf   :  { %s28_s20 = sshll.u32 %s1151_s19, 4  ;;  %s29_s20 = int_to_ptr.vmem [resolvable:$true] %s28_s20 }
  0x10   :  { %s1110_s21 = scalar_lea.vmem %s29_s20, 12288  ;;  %p1115_p6 = scmp.lt.s32.totalorder %s29_s20, %s29_s20 }
  0x11   :  { %p1111_p5 = scmp.ne.s32.totalorder %s29_s20, %s1110_s21  ;;  %p1116_p7 = scmp.lt.s32.totalorder %s1110_s21, %s1110_s21 }
  0x13   :  { %p1117_p8 = por %p1116_p7, %p1115_p6 }
  0x15   :  { %p1118_p9 = pnand %p1117_p8, %p1111_p5 }
  0x17   :  { %1121 = shalt.err (!%p1118_p9)
}
  0x18   :  { %s1152_s22 = smov 128   ;;  %s1153_s23 = smov 8  }
  0x19   :  { %34 = dma.hbm_to_vmem [thread:$0]  %s1190_s1, 12288, %s29_s20, [#allocation6], %s1152_s22, %s1152_s22, %s1153_s23  }
  0x1a   :  { %1142 = dma.done.wait [#allocation3], 768  }
  0x1b   :  { %1143 = vsyncadd [#allocation3], 4294966528 }
  0x1c   :  { %1144 = dma.done.wait [#allocation6], 12288  }
  0x1d   :  { %1145 = vsyncadd [#allocation6], 4294955008  ;;  %v929_v0 = vld [vmem:[#allocation5 + $0x74] ss:$8 sps:$4 sm:$0xff]   ;;  %v931_v1 = vld [vmem:[#allocation5 + $0x70] ss:$8 sps:$4 sm:$0xff]  }
  0x1e   :  { %667 = vmatprep.subr.bf16.mxu0 %v929_v0  ;;  %v932_v2 = vld [vmem:[#allocation5 + $0x174] ss:$8 sps:$4 sm:$0xff]   ;;  %v934_v3 = vld [vmem:[#allocation5 + $0x170] ss:$8 sps:$4 sm:$0xff]   ;;  %v935_v4 = vld [vmem:[#allocation5 + $0x64] ss:$8 sps:$4 sm:$0xff]  }
  0x1f   :  { %668 = vmatpush1.bf16.msra.mxu0 %v931_v1  ;;  %v937_v5 = vld [vmem:[#allocation5 + $0x60] ss:$8 sps:$4 sm:$0xff]   ;;  %710 = vmatprep.subr.bf16.mxu1 %v932_v2  ;;  %v938_v6 = vld [vmem:[#allocation5 + $0x164] ss:$8 sps:$4 sm:$0xff]   ;;  %v941_v8 = vld [vmem:[#allocation5 + $0x54] ss:$8 sps:$4 sm:$0xff]  }
  0x20   :  { %711 = vmatpush1.bf16.msra.mxu1 %v934_v3  ;;  %669 = vmatprep.subr.bf16.mxu0 %v935_v4  ;;  %v940_v7 = vld [vmem:[#allocation5 + $0x160] ss:$8 sps:$4 sm:$0xff]   ;;  %v943_v9 = vld [vmem:[#allocation5 + $0x50] ss:$8 sps:$4 sm:$0xff]   ;;  %v944_v10 = vld [vmem:[#allocation5 + $0x154] ss:$8 sps:$4 sm:$0xff]  }
  0x21   :  { %712 = vmatprep.subr.bf16.mxu1 %v938_v6  ;;  %v947_v11 = vld [vmem:[#allocation5 + $0x44] ss:$8 sps:$4 sm:$0xff]   ;;  %v946_v12 = vld [vmem:[#allocation5 + $0x150] ss:$8 sps:$4 sm:$0xff]   ;;  %v949_v14 = vld [vmem:[#allocation5 + $0x40] ss:$8 sps:$4 sm:$0xff]  }
  0x22   :  { %v950_v13 = vld [vmem:[#allocation5 + $0x144] ss:$8 sps:$4 sm:$0xff]   ;;  %v953_v15 = vld [vmem:[#allocation5 + $0x34] ss:$8 sps:$4 sm:$0xff]   ;;  %v952_v16 = vld [vmem:[#allocation5 + $0x140] ss:$8 sps:$4 sm:$0xff]  }
  0x23   :  { %670 = vmatpush1.bf16.msra.mxu0 %v937_v5  ;;  %v956_v17 = vld [vmem:[#allocation5 + $0x134] ss:$8 sps:$4 sm:$0xff]   ;;  %v955_v18 = vld [vmem:[#allocation5 + $0x30] ss:$8 sps:$4 sm:$0xff]   ;;  %v959_v19 = vld [vmem:[#allocation5 + $0x24] ss:$8 sps:$4 sm:$0xff]  }
  0x24   :  { %671 = vmatprep.subr.bf16.mxu0 %v941_v8  ;;  %713 = vmatpush1.bf16.msra.mxu1 %v940_v7  ;;  %v958_v20 = vld [vmem:[#allocation5 + $0x130] ss:$8 sps:$4 sm:$0xff]   ;;  %v962_v21 = vld [vmem:[#allocation5 + $0x124] ss:$8 sps:$4 sm:$0xff]   ;;  %v961_v22 = vld [vmem:[#allocation5 + $0x20] ss:$8 sps:$4 sm:$0xff]  }
  0x25   :  { %714 = vmatprep.subr.bf16.mxu1 %v944_v10  ;;  %v965_v23 = vld [vmem:[#allocation5 + $0x14] ss:$8 sps:$4 sm:$0xff]   ;;  %v964_v24 = vld [vmem:[#allocation5 + $0x120] ss:$8 sps:$4 sm:$0xff]   ;;  %v967_v26 = vld [vmem:[#allocation5 + $0x10] ss:$8 sps:$4 sm:$0xff]  }
  0x26   :  { %v968_v25 = vld [vmem:[#allocation5 + $0x114] ss:$8 sps:$4 sm:$0xff]   ;;  %v971_v27 = vld [vmem:[#allocation5 + $0x4] ss:$8 sps:$4 sm:$0xff]   ;;  %v970_v28 = vld [vmem:[#allocation5 + $0x110] ss:$8 sps:$4 sm:$0xff]  }
  0x27   :  { %672 = vmatpush1.bf16.msra.mxu0 %v943_v9  ;;  %v974_v29 = vld [vmem:[#allocation5 + $0x104] ss:$8 sps:$4 sm:$0xff]   ;;  %v973_v30 = vld [vmem:[#allocation5] ss:$8 sps:$4 sm:$0xff]   ;;  %v977_v31 = vld [vmem:[#allocation5 + $0xf4] ss:$8 sps:$4 sm:$0xff]  }
  0x28   :  { %673 = vmatprep.subr.bf16.mxu0 %v947_v11  ;;  %715 = vmatpush1.bf16.msra.mxu1 %v946_v12  ;;  %v976_v32 = vld [vmem:[#allocation5 + $0x100] ss:$8 sps:$4 sm:$0xff]   ;;  %v980_v33 = vld [vmem:[#allocation5 + $0x1f4] ss:$8 sps:$4 sm:$0xff]   ;;  %v979_v34 = vld [vmem:[#allocation5 + $0xf0] ss:$8 sps:$4 sm:$0xff]  }
  0x29   :  { %716 = vmatprep.subr.bf16.mxu1 %v950_v13  ;;  %v983_v35 = vld [vmem:[#allocation5 + $0xe4] ss:$8 sps:$4 sm:$0xff]   ;;  %v982_v36 = vld [vmem:[#allocation5 + $0x1f0] ss:$8 sps:$4 sm:$0xff]   ;;  %v985_v38 = vld [vmem:[#allocation5 + $0xe0] ss:$8 sps:$4 sm:$0xff]  }
  0x2a   :  { %v986_v37 = vld [vmem:[#allocation5 + $0x1e4] ss:$8 sps:$4 sm:$0xff]   ;;  %v989_v39 = vld [vmem:[#allocation5 + $0xd4] ss:$8 sps:$4 sm:$0xff]   ;;  %v988_v40 = vld [vmem:[#allocation5 + $0x1e0] ss:$8 sps:$4 sm:$0xff]  }
  0x2b   :  { %674 = vmatpush1.bf16.msra.mxu0 %v949_v14  ;;  %v992_v41 = vld [vmem:[#allocation5 + $0x1d4] ss:$8 sps:$4 sm:$0xff]   ;;  %v991_v42 = vld [vmem:[#allocation5 + $0xd0] ss:$8 sps:$4 sm:$0xff]   ;;  %v995_v43 = vld [vmem:[#allocation5 + $0xc4] ss:$8 sps:$4 sm:$0xff]  }
  0x2c   :  { %675 = vmatprep.subr.bf16.mxu0 %v953_v15  ;;  %717 = vmatpush1.bf16.msra.mxu1 %v952_v16  ;;  %v994_v44 = vld [vmem:[#allocation5 + $0x1d0] ss:$8 sps:$4 sm:$0xff]   ;;  %v998_v45 = vld [vmem:[#allocation5 + $0x1c4] ss:$8 sps:$4 sm:$0xff]   ;;  %v997_v46 = vld [vmem:[#allocation5 + $0xc0] ss:$8 sps:$4 sm:$0xff]  }
  0x2d   :  { %718 = vmatprep.subr.bf16.mxu1 %v956_v17  ;;  %v1026_v47 = vld [vmem:[#allocation2 + $0x4] ss:$24 sps:$4 sm:$0xff]   ;;  %v1000_v49 = vld [vmem:[#allocation5 + $0x1c0] ss:$8 sps:$4 sm:$0xff]   ;;  %v1003_v52 = vld [vmem:[#allocation5 + $0xb0] ss:$8 sps:$4 sm:$0xff]  }
  0x2e   :  { %v1001_v48 = vld [vmem:[#allocation5 + $0xb4] ss:$8 sps:$4 sm:$0xff]   ;;  %699 = vmatprep.mubr.bf16.mxu0 %v1026_v47  ;;  %v1007_v53 = vld [vmem:[#allocation5 + $0xa4] ss:$8 sps:$4 sm:$0xff]   ;;  %v1006_v54 = vld [vmem:[#allocation5 + $0x1b0] ss:$8 sps:$4 sm:$0xff]  }
  0x2f   :  { %676 = vmatpush1.bf16.msra.mxu0 %v955_v18  ;;  %v1004_v50 = vld [vmem:[#allocation5 + $0x1b4] ss:$8 sps:$4 sm:$0xff]   ;;  %v1010_v55 = vld [vmem:[#allocation5 + $0x1a4] ss:$8 sps:$4 sm:$0xff]   ;;  %v1009_v56 = vld [vmem:[#allocation5 + $0xa0] ss:$8 sps:$4 sm:$0xff]  }
  0x30   :  { %677 = vmatprep.subr.bf16.mxu0 %v959_v19  ;;  %719 = vmatpush1.bf16.msra.mxu1 %v958_v20  ;;  %v1033_v51 = vld [vmem:[#allocation2 + $0xc] ss:$24 sps:$4 sm:$0xff]   ;;  %v1012_v58 = vld [vmem:[#allocation5 + $0x1a0] ss:$8 sps:$4 sm:$0xff]   ;;  %v1015_v60 = vld [vmem:[#allocation5 + $0x90] ss:$8 sps:$4 sm:$0xff]  }
  0x31   :  { %720 = vmatprep.subr.bf16.mxu1 %v962_v21  ;;  %742 = vmatprep.mubr.bf16.mxu1 %v1033_v51  ;;  %v1013_v57 = vld [vmem:[#allocation5 + $0x94] ss:$8 sps:$4 sm:$0xff]   ;;  %v1019_v61 = vld [vmem:[#allocation5 + $0x84] ss:$8 sps:$4 sm:$0xff]   ;;  %v1018_v62 = vld [vmem:[#allocation5 + $0x190] ss:$8 sps:$4 sm:$0xff]  }
  0x32   :  { %v1016_v59 = vld [vmem:[#allocation5 + $0x194] ss:$8 sps:$4 sm:$0xff]   ;;  %v1022_v63 = vld [vmem:[#allocation5 + $0x184] ss:$8 sps:$4 sm:$0xff]   ;;  %v1021_v0 = vld [vmem:[#allocation5 + $0x80] ss:$8 sps:$4 sm:$0xff]  }
  0x33   :  { %678 = vmatpush1.bf16.msra.mxu0 %v961_v22  ;;  %v1030_v1 = vld [vmem:[#allocation5 + $0x274] ss:$8 sps:$4 sm:$0xff]   ;;  %v1027_v2 = vld [vmem:[#allocation5 + $0x180] ss:$8 sps:$4 sm:$0xff]   ;;  %v1028_v4 = vld [vmem:[#allocation5 + $0x270] ss:$8 sps:$4 sm:$0xff]  }
  0x34   :  { %679 = vmatprep.subr.bf16.mxu0 %v965_v23  ;;  %721 = vmatpush1.bf16.msra.mxu1 %v964_v24  ;;  %v1024_v3 = vld [vmem:[#allocation2] ss:$24 sps:$4 sm:$0xff]   ;;  %v1036_v6 = vld [vmem:[#allocation5 + $0x264] ss:$8 sps:$4 sm:$0xff]   ;;  %v1039_v9 = vld [vmem:[#allocation5 + $0x254] ss:$8 sps:$4 sm:$0xff]  }
  0x35   :  { %722 = vmatprep.subr.bf16.mxu1 %v968_v25  ;;  %v1031_v5 = vld [vmem:[#allocation2 + $0x8] ss:$24 sps:$4 sm:$0xff]   ;;  %v1034_v7 = vld [vmem:[#allocation5 + $0x260] ss:$8 sps:$4 sm:$0xff]   ;;  %v1081_v8 = vld [vmem:[#allocation2 + $0x14] ss:$24 sps:$4 sm:$0xff]  }
  0x36   :  { %v1037_v10 = vld [vmem:[#allocation5 + $0x250] ss:$8 sps:$4 sm:$0xff]   ;;  %v1042_v11 = vld [vmem:[#allocation5 + $0x244] ss:$8 sps:$4 sm:$0xff]   ;;  %v1040_v12 = vld [vmem:[#allocation5 + $0x240] ss:$8 sps:$4 sm:$0xff]  }
  0x37   :  { %680 = vmatpush1.bf16.msra.mxu0 %v967_v26  ;;  %v1045_v13 = vld [vmem:[#allocation5 + $0x234] ss:$8 sps:$4 sm:$0xff]   ;;  %v1043_v14 = vld [vmem:[#allocation5 + $0x230] ss:$8 sps:$4 sm:$0xff]   ;;  %v1048_v15 = vld [vmem:[#allocation5 + $0x224] ss:$8 sps:$4 sm:$0xff]  }
  0x38   :  { %681 = vmatprep.subr.bf16.mxu0 %v971_v27  ;;  %723 = vmatpush1.bf16.msra.mxu1 %v970_v28  ;;  %v1046_v16 = vld [vmem:[#allocation5 + $0x220] ss:$8 sps:$4 sm:$0xff]   ;;  %v1051_v17 = vld [vmem:[#allocation5 + $0x214] ss:$8 sps:$4 sm:$0xff]   ;;  %v1049_v18 = vld [vmem:[#allocation5 + $0x210] ss:$8 sps:$4 sm:$0xff]  }
  0x39   :  { %724 = vmatprep.subr.bf16.mxu1 %v974_v29  ;;  %v1054_v19 = vld [vmem:[#allocation5 + $0x204] ss:$8 sps:$4 sm:$0xff]   ;;  %v1052_v20 = vld [vmem:[#allocation5 + $0x200] ss:$8 sps:$4 sm:$0xff]   ;;  %v1057_v21 = vld [vmem:[#allocation5 + $0x2f4] ss:$8 sps:$4 sm:$0xff]  }
  0x3a   :  { %v1055_v22 = vld [vmem:[#allocation5 + $0x2f0] ss:$8 sps:$4 sm:$0xff]   ;;  %v1060_v23 = vld [vmem:[#allocation5 + $0x2e4] ss:$8 sps:$4 sm:$0xff]   ;;  %v1058_v24 = vld [vmem:[#allocation5 + $0x2e0] ss:$8 sps:$4 sm:$0xff]  }
  0x3b   :  { %682 = vmatpush1.bf16.msra.mxu0 %v973_v30  ;;  %v1063_v25 = vld [vmem:[#allocation5 + $0x2d4] ss:$8 sps:$4 sm:$0xff]   ;;  %v1061_v26 = vld [vmem:[#allocation5 + $0x2d0] ss:$8 sps:$4 sm:$0xff]   ;;  %v1066_v27 = vld [vmem:[#allocation5 + $0x2c4] ss:$8 sps:$4 sm:$0xff]  }
  0x3c   :  { %683 = vmatprep.subr.bf16.mxu0 %v977_v31  ;;  %725 = vmatpush1.bf16.msra.mxu1 %v976_v32  ;;  %v1064_v28 = vld [vmem:[#allocation5 + $0x2c0] ss:$8 sps:$4 sm:$0xff]   ;;  %v1069_v29 = vld [vmem:[#allocation5 + $0x2b4] ss:$8 sps:$4 sm:$0xff]   ;;  %v1067_v30 = vld [vmem:[#allocation5 + $0x2b0] ss:$8 sps:$4 sm:$0xff]  }
  0x3d   :  { %726 = vmatprep.subr.bf16.mxu1 %v980_v33  ;;  %v1072_v31 = vld [vmem:[#allocation5 + $0x2a4] ss:$8 sps:$4 sm:$0xff]   ;;  %v1070_v32 = vld [vmem:[#allocation5 + $0x2a0] ss:$8 sps:$4 sm:$0xff]   ;;  %v1075_v33 = vld [vmem:[#allocation5 + $0x294] ss:$8 sps:$4 sm:$0xff]  }
  0x3f   :  { %684 = vmatpush2.bf16.msra.mxu0 %v979_v34  ;;  %v1073_v34 = vld [vmem:[#allocation5 + $0x290] ss:$8 sps:$4 sm:$0xff]  }
  0x40   :  { %685 = vmatprep.subr.bf16.mxu0 %v983_v35  ;;  %727 = vmatpush2.bf16.msra.mxu1 %v982_v36  ;;  %v1078_v35 = vld [vmem:[#allocation5 + $0x284] ss:$8 sps:$4 sm:$0xff]   ;;  %v1076_v36 = vld [vmem:[#allocation5 + $0x280] ss:$8 sps:$4 sm:$0xff]  }
  0x41   :  { %728 = vmatprep.subr.bf16.mxu1 %v986_v37  ;;  %v1079_v37 = vld [vmem:[#allocation2 + $0x10] ss:$24 sps:$4 sm:$0xff]  }
  0x43   :  { %686 = vmatpush2.bf16.msra.mxu0 %v985_v38  ;;  %v147_v38 = vlaneseq }
  0x44   :  { %687 = vmatprep.subr.bf16.mxu0 %v989_v39  ;;  %729 = vmatpush2.bf16.msra.mxu1 %v988_v40 }
  0x45   :  { %730 = vmatprep.subr.bf16.mxu1 %v992_v41  ;;  %v148_v39 = vshrl.u32 %v147_v38, 7 }
  0x47   :  { %688 = vmatpush2.bf16.msra.mxu0 %v991_v42  ;;  %v149_v41 = vsub.s32 0, %v148_v39  ;;  %v145_v42 = vld [vmem:[%s1191_s2] sm:$0x3]  ;;  %s1154_s2 = smov [#allocation7]  }
  0x48   :  { %689 = vmatprep.subr.bf16.mxu0 %v995_v43  ;;  %731 = vmatpush2.bf16.msra.mxu1 %v994_v44  ;;  %v153_v43 = vsub.s32 1, %v148_v39  ;;  %s805_s26 = sshll.u32 %s1154_s2, 4  ;;  %s806_s26 = int_to_ptr.vmem [resolvable:$true] %s805_s26 }
  0x49   :  { %732 = vmatprep.subr.bf16.mxu1 %v998_v45  ;;  %s1122_s27 = scalar_lea.vmem %s806_s26, 512  ;;  %p1127_p11 = scmp.lt.s32.totalorder %s806_s26, %s806_s26 }
  0x4a   :  { %v154_v47 = vrot.slane %v145_v42, %v153_v43  ;;  %p1123_p10 = scmp.ne.s32.totalorder %s806_s26, %s1122_s27  ;;  %p1128_p12 = scmp.lt.s32.totalorder %s1122_s27, %s1122_s27 }
  0x4b   :  { %690 = vmatpush2.bf16.msra.mxu0 %v997_v46  ;;  %v150_v46 = vrot.slane %v145_v42, %v149_v41 }
  0x4c   :  { %691 = vmatprep.subr.bf16.mxu0 %v1001_v48  ;;  %733 = vmatpush2.bf16.msra.mxu1 %v1000_v49  ;;  %p1129_p13 = por %p1128_p12, %p1127_p11 }
  0x4d   :  { %734 = vmatprep.subr.bf16.mxu1 %v1004_v50 }
  0x4e   :  { %p1130_p0 = pnand %p1129_p13, %p1123_p10 }
  0x4f   :  { %692 = vmatpush2.bf16.msra.mxu0 %v1003_v52 }
  0x50   :  { %693 = vmatprep.subr.bf16.mxu0 %v1007_v53  ;;  %735 = vmatpush2.bf16.msra.mxu1 %v1006_v54 }
  0x51   :  { %736 = vmatprep.subr.bf16.mxu1 %v1010_v55 }
  0x53   :  { %694 = vmatpush2.bf16.msra.mxu0 %v1009_v56 }
  0x54   :  { %695 = vmatprep.subr.bf16.mxu0 %v1013_v57  ;;  %737 = vmatpush2.bf16.msra.mxu1 %v1012_v58 }
  0x55   :  { %738 = vmatprep.subr.bf16.mxu1 %v1016_v59 }
  0x57   :  { %696 = vmatpush2.bf16.msra.mxu0 %v1015_v60 }
  0x58   :  { %697 = vmatprep.subr.bf16.mxu0 %v1019_v61  ;;  %739 = vmatpush2.bf16.msra.mxu1 %v1018_v62 }
  0x59   :  { %740 = vmatprep.subr.bf16.mxu1 %v1022_v63 }
  0x5b   :  { %698 = vmatpush2.bf16.msra.mxu0 %v1021_v0 }
  0x5c   :  { %753 = vmatprep.subr.bf16.mxu0 %v1030_v1  ;;  %741 = vmatpush2.bf16.msra.mxu1 %v1027_v2 }
  0x5e   :  { %700 = vmatmul.mubr.bf16.vlgmr.msra.gmra.mxu0 %v1024_v3 }
  0x5f   :  { %754 = vmatpush1.bf16.msra.mxu0 %v1028_v4  ;;  %743 = vmatmul.mubr.bf16.vlgmr.msra.gmra.mxu1 %v1031_v5 }
  0x60   :  { %755 = vmatprep.subr.bf16.mxu0 %v1036_v6  ;;  %785 = vmatprep.mubr.bf16.mxu0 %v1081_v8 }
  0x63   :  { %756 = vmatpush1.bf16.msra.mxu0 %v1034_v7 }
  0x64   :  { %757 = vmatprep.subr.bf16.mxu0 %v1039_v9 }
  0x67   :  { %758 = vmatpush1.bf16.msra.mxu0 %v1037_v10 }
  0x68   :  { %759 = vmatprep.subr.bf16.mxu0 %v1042_v11 }
  0x6b   :  { %760 = vmatpush1.bf16.msra.mxu0 %v1040_v12 }
  0x6c   :  { %761 = vmatprep.subr.bf16.mxu0 %v1045_v13 }
  0x6f   :  { %762 = vmatpush1.bf16.msra.mxu0 %v1043_v14 }
  0x70   :  { %763 = vmatprep.subr.bf16.mxu0 %v1048_v15 }
  0x73   :  { %764 = vmatpush1.bf16.msra.mxu0 %v1046_v16 }
  0x74   :  { %765 = vmatprep.subr.bf16.mxu0 %v1051_v17 }
  0x77   :  { %766 = vmatpush1.bf16.msra.mxu0 %v1049_v18 }
  0x78   :  { %767 = vmatprep.subr.bf16.mxu0 %v1054_v19 }
  0x7b   :  { %768 = vmatpush1.bf16.msra.mxu0 %v1052_v20 }
  0x7c   :  { %769 = vmatprep.subr.bf16.mxu0 %v1057_v21 }
  0x7f   :  { %770 = vmatpush2.bf16.msra.mxu0 %v1055_v22 }
  0x80   :  { %771 = vmatprep.subr.bf16.mxu0 %v1060_v23 }
  0x83   :  { %772 = vmatpush2.bf16.msra.mxu0 %v1058_v24 }
  0x84   :  { %773 = vmatprep.subr.bf16.mxu0 %v1063_v25 }
  0x87   :  { %774 = vmatpush2.bf16.msra.mxu0 %v1061_v26 }
  0x88   :  { %775 = vmatprep.subr.bf16.mxu0 %v1066_v27 }
  0x8b   :  { %776 = vmatpush2.bf16.msra.mxu0 %v1064_v28 }
  0x8c   :  { %777 = vmatprep.subr.bf16.mxu0 %v1069_v29 }
  0x8f   :  { %778 = vmatpush2.bf16.msra.mxu0 %v1067_v30 }
  0x90   :  { %779 = vmatprep.subr.bf16.mxu0 %v1072_v31 }
  0x93   :  { %780 = vmatpush2.bf16.msra.mxu0 %v1070_v32 }
  0x94   :  { %781 = vmatprep.subr.bf16.mxu0 %v1075_v33 }
  0x97   :  { %782 = vmatpush2.bf16.msra.mxu0 %v1073_v34 }
  0x98   :  { %783 = vmatprep.subr.bf16.mxu0 %v1078_v35 }
  0x9b   :  { %784 = vmatpush2.bf16.msra.mxu0 %v1076_v36 }
  0x9e   :  { %786 = vmatmul.mubr.bf16.vlgmr.msra.gmra.mxu0 %v1079_v37 }
 0x11e   :  { %v701_v40 = vpop.f32.mrf.mxu0 }
 0x11f   :  { %v744_v45 = vpop.f32.mrf.mxu1  ;;  %v702_v50 = vadd.f32 %v701_v40, %v150_v46 }
 0x120   :  { %v703_v44 = vpop.f32.mrf.mxu0 }
 0x121   :  { %v746_v49 = vpop.f32.mrf.mxu1  ;;  %v704_v51 = vadd.f32 %v703_v44, %v154_v47  ;;  %v745_v54 = vadd.f32 %v744_v45, %v702_v50 }
 0x122   :  { %v705_v48 = vpop.f32.mrf.mxu0 }
 0x123   :  { %v748_v53 = vpop.f32.mrf.mxu1  ;;  %v706_v55 = vadd.f32 %v705_v48, %v150_v46  ;;  %v747_v57 = vadd.f32 %v746_v49, %v704_v51 }
 0x124   :  { %v707_v52 = vpop.f32.mrf.mxu0 }
 0x125   :  { %v708_v58 = vadd.f32 %v707_v52, %v154_v47  ;;  %v750_v60 = vpop.f32.mrf.mxu1  ;;  %v749_v62 = vadd.f32 %v748_v53, %v706_v55 }
 0x127   :  { %v751_v1 = vadd.f32 %v750_v60, %v708_v58 }
 0x15e   :  { %v787_v56 = vpop.f32.mrf.mxu0 }
 0x15f   :  { %v788_v59 = vadd.f32 %v787_v56, %v745_v54 }
 0x160   :  { %v789_v61 = vpop.f32.mrf.mxu0 }
 0x161   :  { %796 = vst [vmem:[#allocation7] sm:$0xff] %v788_v59  ;;  %v790_v63 = vadd.f32 %v789_v61, %v747_v57 }
 0x162   :  { %v791_v0 = vpop.f32.mrf.mxu0 }
 0x163   :  { %797 = vst [vmem:[#allocation7 + $0x8] sm:$0xff] %v790_v63  ;;  %v792_v2 = vadd.f32 %v791_v0, %v749_v62 }
 0x164   :  { %v793_v3 = vpop.f32.mrf.mxu0 }
 0x165   :  { %798 = vst [vmem:[#allocation7 + $0x10] sm:$0xff] %v792_v2  ;;  %v794_v4 = vadd.f32 %v793_v3, %v751_v1 }
 0x167   :  { %799 = vst [vmem:[#allocation7 + $0x18] sm:$0xff] %v794_v4 }
 0x168   :  { %1133 = shalt.err (!%p1130_p0)
}
 0x169   :  { %s1155_s28 = smov 256   ;;  %s1156_s29 = smov 16  }
 0x16a   :  { %811 = dma.vmem_to_hbm [thread:$0]  %s806_s26, 512, %s1192_s3, [#allocation4], %s1155_s28, %s1155_s28, %s1156_s29  }
 0x16b   :  { %1146 = dma.done.wait [#allocation4], 512  }
 0x16c   :  { %1147 = vsyncadd [#allocation4], 4294966784 }
 0x16d   :  { %815 = vsyncpa [#allocation3], 1 }
 0x16e   :  { %816 = vsyncpa [#allocation6], 1 }
 0x16f   :  { %817 = vsyncpa [#allocation4], 1 }

</bundles_post_ra>
